<compile_context>
chip_gen: v5e
topology: v5e:2x2
jax: 0.10.0
libtpu: 0.0.40
codegen_flags: <defaults>
</compile_context>

<pallas_src>
import math

import jax
import jax.numpy as jnp
from jax.experimental import pallas as pl
from jax.experimental.pallas import tpu as pltpu


# ---------------------------------------------------------------------------
# Hardware-generation detection (best effort; unknown -> safe defaults).
# ---------------------------------------------------------------------------
def _device_kind():
    try:
        return getattr(jax.devices()[0], "device_kind", "").lower()
    except Exception:
        return ""


_KIND = _device_kind()
_IS_V5 = "v5" in _KIND                     # no bf16 VPU/EUP -> f32 compute
_IS_V7 = "v7" in _KIND                     # 2 TCs/chip, 64 MiB VMEM per TC
_BIG_VMEM = ("v5" in _KIND) or ("v6" in _KIND)   # 128 MiB physical VMEM

if _BIG_VMEM:
    _TARGET_BLOCK_BYTES = 8 << 20          # 8 MiB blocks -> ~32 MiB resident
    _VMEM_LIMIT_BYTES = 64 << 20
else:                                      # v7x or unknown: conservative
    _TARGET_BLOCK_BYTES = 4 << 20          # 4 MiB blocks -> ~16 MiB resident
    _VMEM_LIMIT_BYTES = 32 << 20

# v7x has ~2.3x v6e HBM bandwidth: fixed launch/DMA-setup cost covers more
# bytes, so fall back to fused XLA for larger inputs there.
_DEFAULT_MIN_PALLAS_BYTES = (2 << 20) if _IS_V7 else (1 << 20)

_LANE_CANDIDATES = (1024, 512, 256, 128)   # lane-dense widths (x128 multiples)


def _round_up(x, m):
    return ((x + m - 1) // m) * m


def _sublane_packing(dtype):
    # Rows per packed vreg sublane tile: 8 (4-byte), 16 (2-byte), 32 (1-byte).
    return max(8, 32 // jnp.dtype(dtype).itemsize)


def _make_lambda_kernel(func):
    """Pallas kernel body applying `func` elementwise to one VMEM tile."""

    def kernel(x_ref, o_ref):
        o_ref[...] = func(x_ref[...]).astype(o_ref.dtype)

    return kernel


class PallasLambda:
    """JAX/Pallas equivalent of fengshen megatron `Lambda(func)`.

    `func` must be elementwise (shape-preserving AND position-independent) and
    jnp-traceable, which is how Lambda is used in the reference codebase.
    NOTE: the eval_shape probe only verifies shape preservation; a
    shape-preserving but position-dependent func (flip, softmax, roll, ...)
    would silently give wrong results after the lane-dense re-flattening and
    is NOT supported by the Pallas path.
    """

    def __init__(self, func, min_pallas_bytes=None):
        self.func = func
        self._kernel = _make_lambda_kernel(func)
        self._min_pallas_bytes = (
            _DEFAULT_MIN_PALLAS_BYTES if min_pallas_bytes is None
            else min_pallas_bytes)

    def __call__(self, x):
        orig_shape = x.shape
        total = int(math.prod(orig_shape)) if orig_shape else 1
        in_itemsize = jnp.dtype(x.dtype).itemsize

        # Probe func's output dtype and the shape-preserving contract.
        probe = jax.eval_shape(
            self.func, jax.ShapeDtypeStruct((8, 128), x.dtype))
        if probe.shape != (8, 128):
            raise ValueError(
                "PallasLambda requires an elementwise (shape-preserving) func.")
        out_dtype = probe.dtype
        out_itemsize = jnp.dtype(out_dtype).itemsize

        # Tiny inputs: pallas launch + DMA setup dwarfs compute -> plain XLA.
        if total == 0 or total * in_itemsize < self._min_pallas_bytes:
            return self.func(x)

        # --- Lane-dense layout WITHOUT a padding pass. ----------------------
        # Pallas handles the 128-aligned prefix; the (<128 elem) tail goes to
        # plain XLA.  For 128-divisible totals (the common case) this is a
        # zero-copy free reshape: no pad, no slice, no concat.
        main_elems = (total // 128) * 128
        if main_elems == 0:
            return self.func(x)
        tail_elems = total - main_elems

        lanes = 128
        for cand in _LANE_CANDIDATES:
            if main_elems % cand == 0:
                lanes = cand
                break
        rows = main_elems // lanes

        flat = x.reshape(-1)
        if tail_elems:
            x2d = flat[:main_elems].reshape(rows, lanes)
        else:
            x2d = flat.reshape(rows, lanes)          # free bitcast reshape

        # --- dtype-aware sublane packing + VMEM-budget tile sizing. ---------
        packing = max(_sublane_packing(x.dtype), _sublane_packing(out_dtype))
        max_itemsize = max(in_itemsize, out_itemsize)
        tile_rows = _TARGET_BLOCK_BYTES // (lanes * max_itemsize)
        tile_rows = max(packing, (tile_rows // packing) * packing)
        if tile_rows >= rows:
            tile_rows = rows                          # single full-array block
        # v7x megacore: ensure the "parallel" axis has >= 2 blocks so both
        # TensorCores get work (harmless ragged last block, masked writes).
        if _IS_V7 and rows > packing and pl.cdiv(rows, tile_rows) < 2:
            tile_rows = max(packing, _round_up(pl.cdiv(rows, 2), packing))
        grid = (pl.cdiv(rows, tile_rows),)

        # --- Cost estimate: derive from func itself when possible. ----------
        try:
            cost = pl.estimate_cost(
                self.func, jax.ShapeDtypeStruct((rows, lanes), x.dtype))
        except Exception:
            cost = pl.CostEstimate(
                flops=2 * rows * lanes,
                transcendentals=0,
                bytes_accessed=rows * lanes * (in_itemsize + out_itemsize))

        out2d = pl.pallas_call(
            self._kernel,
            out_shape=jax.ShapeDtypeStruct((rows, lanes), out_dtype),
            grid_spec=pltpu.PrefetchScalarGridSpec(
                num_scalar_prefetch=0,
                grid=grid,
                in_specs=[pl.BlockSpec((tile_rows, lanes), lambda i: (i, 0))],
                out_specs=pl.BlockSpec((tile_rows, lanes), lambda i: (i, 0)),
            ),
            compiler_params=pltpu.CompilerParams(
                dimension_semantics=("parallel",),
                vmem_limit_bytes=_VMEM_LIMIT_BYTES,
            ),
            cost_estimate=cost,
        )(x2d)

        out_flat = out2d.reshape(-1)
        if tail_elems:
            tail = self.func(flat[main_elems:]).astype(out_dtype)
            out_flat = jnp.concatenate([out_flat, tail])
        return out_flat.reshape(orig_shape)


def _gelu_compute_dtype(dtype):
    # v6e/v7x have bf16 VPU/EUP -> compute bf16 end-to-end; v5e (and unknown
    # chips) compute in f32 for safety/accuracy.
    if jnp.dtype(dtype) == jnp.dtype(jnp.bfloat16) and not _IS_V5 and _KIND:
        return jnp.bfloat16
    return jnp.float32


def gelu_tanh(x):
    # tanh-approximation GELU (matches F.gelu(approximate='tanh')).
    cd = _gelu_compute_dtype(x.dtype)
    xf = x.astype(cd)
    c = jnp.asarray(0.7978845608028654, cd)   # sqrt(2/pi)
    a = jnp.asarray(0.044715, cd)
    y = jnp.asarray(0.5, cd) * xf * (
        jnp.asarray(1.0, cd) + jnp.tanh(c * (xf + a * xf * xf * xf)))
    return y.astype(x.dtype)


if __name__ == "__main__":
    # Small NCHW input consistent with conv-style usage: batch=2, C=4, H=W=16.
    key = jax.random.PRNGKey(0)
    x = jax.random.normal(key, (2, 4, 16, 16), dtype=jnp.float32)

    # Force the Pallas path for the tiny spec-sized demo tensor.
    lam_forced = PallasLambda(gelu_tanh, min_pallas_bytes=0)
    y = jax.block_until_ready(lam_forced(x))
    y_ref = gelu_tanh(x)
    assert y.shape == x.shape and y.dtype == y_ref.dtype
    assert jnp.allclose(y, y_ref, atol=1e-5, rtol=1e-5), "mismatch vs reference"

    # Larger f32 slab (8 MiB, 128-divisible) exercising the zero-copy tiled
    # streaming path with the default size threshold.
    lam = PallasLambda(gelu_tanh)
    x2 = jax.random.normal(jax.random.PRNGKey(1), (8, 64, 32, 128),
                           dtype=jnp.float32)
    y2 = jax.block_until_ready(lam(x2))
    assert jnp.allclose(y2, gelu_tanh(x2), atol=1e-5, rtol=1e-5), "mismatch (large)"

    # Ragged total (3*5*7*11 = 1155) exercising the aligned-prefix + XLA-tail
    # path (no padded buffer is materialized).
    x3 = jax.random.normal(jax.random.PRNGKey(2), (3, 5, 7, 11),
                           dtype=jnp.float32)
    y3 = jax.block_until_ready(lam_forced(x3))
    assert jnp.allclose(y3, gelu_tanh(x3), atol=1e-5, rtol=1e-5), "mismatch (ragged)"

    # bf16 activations: exercises 16-row sublane packing and bf16-in/bf16-out
    # HBM traffic (bf16 compute on v6e/v7x, f32 compute on v5e).
    xb = jax.random.normal(jax.random.PRNGKey(3), (2, 8, 1024),
                           dtype=jnp.float32).astype(jnp.bfloat16)
    yb = jax.block_until_ready(lam_forced(xb))
    assert yb.dtype == jnp.bfloat16
    assert jnp.allclose(yb.astype(jnp.float32),
                        gelu_tanh(xb).astype(jnp.float32),
                        atol=2e-2, rtol=2e-2), "mismatch (bf16)"

    print("KERNEL_OK")
</pallas_src>

<mosaic_0001>
module attributes {stable_mosaic.version = 11 : i64} {
  func.func @kernel(%arg0: i32, %arg1: memref<2x1024xf32, #tpu.memory_space<vmem>>, %arg2: memref<2x1024xf32, #tpu.memory_space<vmem>>) attributes {dimension_semantics = [#tpu.dimension_semantics<parallel>], iteration_bounds = array<i64: 1>, scalar_prefetch = 0 : i64, scratch_operands = 0 : i64, tpu.core_type = #tpu.core_type<tc>, window_params = [{transform_indices = @transform_0, window_bounds = array<i64: 2, 1024>}, {transform_indices = @transform_1, window_bounds = array<i64: 2, 1024>}]} {
    %c0 = arith.constant 0 : index
    %c0_0 = arith.constant 0 : index
    %0 = vector.load %arg1[%c0, %c0_0] : memref<2x1024xf32, #tpu.memory_space<vmem>>, vector<2x1024xf32>
    %cst = arith.constant 5.000000e-01 : f32
    %1 = vector.broadcast %cst : f32 to vector<2x1024xf32>
    %2 = arith.mulf %1, %0 : vector<2x1024xf32>
    %cst_1 = arith.constant 4.471500e-02 : f32
    %3 = vector.broadcast %cst_1 : f32 to vector<2x1024xf32>
    %4 = arith.mulf %3, %0 : vector<2x1024xf32>
    %5 = arith.mulf %4, %0 : vector<2x1024xf32>
    %6 = arith.mulf %5, %0 : vector<2x1024xf32>
    %7 = arith.addf %0, %6 : vector<2x1024xf32>
    %cst_2 = arith.constant 0.797884583 : f32
    %8 = vector.broadcast %cst_2 : f32 to vector<2x1024xf32>
    %9 = arith.mulf %8, %7 : vector<2x1024xf32>
    %10 = math.tanh %9 : vector<2x1024xf32>
    %cst_3 = arith.constant 1.000000e+00 : f32
    %11 = vector.broadcast %cst_3 : f32 to vector<2x1024xf32>
    %12 = arith.addf %11, %10 : vector<2x1024xf32>
    %13 = arith.mulf %2, %12 : vector<2x1024xf32>
    %c0_4 = arith.constant 0 : index
    %c0_5 = arith.constant 0 : index
    %14 = vector.load %arg2[%c0_4, %c0_5] : memref<2x1024xf32, #tpu.memory_space<vmem>>, vector<2x1024xf32>
    tpu.vector_store %arg2[%c0_4, %c0_5], %13 {strides = array<i32>} : memref<2x1024xf32, #tpu.memory_space<vmem>>, vector<2x1024xf32>,
    return
  }
  func.func @transform_0(%arg0: i32) -> (i32, i32) {
    %c0_i32 = arith.constant 0 : i32
    %c0_i32_0 = arith.constant 0 : i32
    return %arg0, %c0_i32 : i32, i32
  }
  func.func @transform_1(%arg0: i32) -> (i32, i32) {
    %c0_i32 = arith.constant 0 : i32
    %c0_i32_0 = arith.constant 0 : i32
    return %arg0, %c0_i32 : i32, i32
  }
}

</mosaic_0001>

<bundles_post_ra>
// kernel: tpu_custom_call.1
= control target key start
LH: loop header
LB: loop body
LE: loop exit
PB: predicated region body
PF: predicated region fallthrough
CT: control target
= control target key end

     0   :  { %6 = vsyncpa [#allocation3], 0  ;;  %s138_s0 = inlined_call_operand.hbm [shape: f32[2,1024], index: 0, kind: input, shape index: {}]   ;;  %s139_s1 = inlined_call_operand.hbm [shape: f32[2,1024], index: 1, kind: output, shape index: {}]  }
   0x1   :  { %7 = vsyncpa [#allocation4], 0  ;;  %s13_s8 = sshll.u32 %s138_s0, 4  ;;  %s120_s9 = smov [#allocation2]   ;;  %s14_s8 = int_to_ptr.hbm [resolvable:$true] %s13_s8 }
   0x2   :  { %s15_s10 = sshll.u32 %s120_s9, 4  ;;  %s16_s10 = int_to_ptr.vmem [resolvable:$true] %s15_s10 }
   0x3   :  { %18 = dma.hbm_to_vmem [thread:$0]  %s14_s8, 256, %s16_s10, [#allocation3]  }
   0x4   :  { %116 = dma.done.wait [#allocation3], 256  }
   0x5   :  { %117 = vsyncadd [#allocation3], 4294967040  ;;  %v23_v0 = vld [vmem:[#allocation2] sm:$0xff]  ;;  %v24_v1 = vld [vmem:[#allocation2 + $0x8] sm:$0xff]  ;;  %s121_s0 = smov [#allocation5]   ;;  %s52_s14 = sshll.u32 %s139_s1, 4  ;;  %s53_s14 = int_to_ptr.hbm [resolvable:$true] %s52_s14 }
   0x6   :  { %v27_v2 = vmul.f32 0.044715, %v23_v0  ;;  %v28_v3 = vmul.f32 0.044715, %v24_v1  ;;  %v25_v12 = vmul.f32 0.5, %v23_v0  ;;  %v26_v14 = vmul.f32 0.5, %v24_v1 }
   0x7   :  { %s50_s11 = sshll.u32 %s121_s0, 4  ;;  %s51_s11 = int_to_ptr.vmem [resolvable:$true] %s50_s11 }
   0x8   :  { %v29_v4 = vmul.f32 %v27_v2, %v23_v0  ;;  %v30_v5 = vmul.f32 %v28_v3, %v24_v1 }
   0xa   :  { %v31_v6 = vmul.f32 %v29_v4, %v23_v0  ;;  %v32_v7 = vmul.f32 %v30_v5, %v24_v1 }
   0xc   :  { %v33_v8 = vadd.f32 %v31_v6, %v23_v0  ;;  %v34_v9 = vadd.f32 %v32_v7, %v24_v1 }
   0xe   :  { %v35_v10 = vmul.f32 0.7978846, %v33_v8  ;;  %v36_v11 = vmul.f32 0.7978846, %v34_v9 }
  0x10   :  { %64 = vtanh.f32 %v35_v10 }
  0x11   :  { %66 = vtanh.f32 %v36_v11 }
  0x16   :  { %v65_v13 = vpop.eup %64 }
  0x17   :  { %v67_v15 = vpop.eup %66  ;;  %v39_v16 = vadd.f32 1.0, %v65_v13 }
  0x18   :  { %v40_v17 = vadd.f32 1.0, %v67_v15 }
  0x19   :  { %v41_v18 = vmul.f32 %v39_v16, %v25_v12 }
  0x1a   :  { %v42_v19 = vmul.f32 %v40_v17, %v26_v14 }
  0x1b   :  { %43 = vst [vmem:[#allocation5] sm:$0xff] %v41_v18 }
  0x1c   :  { %44 = vst [vmem:[#allocation5 + $0x8] sm:$0xff] %v42_v19 }
  0x1d   :  { %55 = dma.vmem_to_hbm [thread:$0]  %s51_s11, 256, %s53_s14, [#allocation4]  }
  0x1e   :  { %118 = dma.done.wait [#allocation4], 256  }
  0x1f   :  { %119 = vsyncadd [#allocation4], 4294967040 }
  0x20   :  { %60 = vsyncpa [#allocation3], 1 }
  0x21   :  { %61 = vsyncpa [#allocation4], 1 }

</bundles_post_ra>
